<compile_context>
chip_gen: v7x
topology: tpu7x:2x2x1
jax: 0.10.0
libtpu: 0.0.40
codegen_flags: <defaults>
</compile_context>

<pallas_src>
import math
from functools import partial

import jax
import jax.numpy as jnp
from jax.experimental import pallas as pl
from jax.experimental.pallas import tpu as pltpu


def _round_up(n: int, m: int) -> int:
    return ((n + m - 1) // m) * m


def _cdiv(a: int, b: int) -> int:
    return (a + b - 1) // b


def _ffn_kernel(*refs, with_mask: bool):
    # Grid: (row_tiles, ff_chunks); ff axis is the reduction ("arbitrary").
    if with_mask:
        x_ref, mask_ref, w1_ref, b1_ref, w2_ref, b2_ref, o_ref, acc_ref = refs
    else:
        x_ref, w1_ref, b1_ref, w2_ref, b2_ref, o_ref, acc_ref = refs
        mask_ref = None

    k = pl.program_id(1)

    @pl.when(k == 0)
    def _init():
        acc_ref[...] = jnp.zeros_like(acc_ref)

    # First matmul: bf16 operands on the MXU, f32 accumulate.
    h = jnp.dot(x_ref[...], w1_ref[...], preferred_element_type=jnp.float32)
    h = h + b1_ref[...]              # f32 bias add
    h = jnp.maximum(h, 0.0)          # ReLU in f32 on the VPU

    if with_mask:
        # Inverted dropout: mask holds exact {0,1}; the 1/keep scale is folded
        # into W2 by the wrapper, so this is the only extra VPU op.
        h = h * mask_ref[...]

    h = h.astype(w2_ref.dtype)       # back to bf16 for the second MXU pass
    acc_ref[...] += jnp.dot(h, w2_ref[...], preferred_element_type=jnp.float32)

    @pl.when(k == pl.num_programs(1) - 1)
    def _finish():
        o_ref[...] = (acc_ref[...] + b2_ref[...]).astype(o_ref.dtype)


def _chip_defaults():
    """(tile_m, vmem_limit_bytes, two_tensorcores) per TPU generation."""
    kind = ""
    try:
        kind = (jax.devices()[0].device_kind or "").lower()
    except Exception:
        pass
    if ("v5" in kind) or ("v6" in kind):
        # 128 MiB VMEM, single TensorCore: big row tiles, generous scoped VMEM.
        return 512, 96 * 1024 * 1024, False
    # v7x (64 MiB per TC, 2 TCs) and unknown backends: conservative budget,
    # make sure the "parallel" row axis has >= 2 steps for megacore sharding.
    return 256, 56 * 1024 * 1024, True


def _vmem_estimate(tile_m, d_model, tk, in_bytes, out_bytes, with_mask):
    """Rough VMEM bytes assuming Pallas' default double-buffering per BlockSpec."""
    est = 2 * tile_m * d_model * in_bytes          # x tile
    est += 2 * tile_m * d_model * out_bytes        # out tile
    est += tile_m * d_model * 4                    # f32 accumulator scratch
    est += 2 * d_model * tk * in_bytes             # W1 chunk
    est += 2 * tk * d_model * in_bytes             # W2 chunk
    est += 2 * (tk + d_model) * 4 * 8              # biases (sublane-padded)
    est += tile_m * tk * 4                         # live f32 h tile
    if with_mask:
        est += 2 * tile_m * tk * in_bytes          # dropout mask chunk
    return est


def positionwise_feed_forward(x, w1, b1, w2, b2, *, p: float = 0.1,
                              training: bool = False, key=None,
                              compute_dtype=jnp.bfloat16,
                              tile_m: int | None = None,
                              ff_chunk: int | None = None):
    """x: (..., d_model); w1: (d_model, d_ff); b1: (d_ff,);
    w2: (d_ff, d_model); b2: (d_model,). Returns same shape/dtype as x.

    Matmuls run with `compute_dtype` operands (bf16 by default) and f32
    accumulation; pass compute_dtype=jnp.float32 if exact fp32-Linear fidelity
    is required (slower on the MXU)."""
    orig_shape = x.shape
    d_model = orig_shape[-1]
    d_ff = w1.shape[1]
    assert w1.shape == (d_model, d_ff)
    assert w2.shape == (d_ff, d_model)
    assert b1.shape == (d_ff,) and b2.shape == (d_model,)
    assert d_model % 128 == 0, "d_model must be a multiple of the 128-lane width"
    assert 0.0 <= p < 1.0, "dropout p must be in [0, 1)"

    cdt = jnp.dtype(compute_dtype)
    in_bytes = cdt.itemsize
    sub = 8 * max(1, 4 // in_bytes)        # sublane multiple: 8 f32 / 16 bf16
    out_dtype = x.dtype
    out_bytes = jnp.dtype(out_dtype).itemsize

    # Lane-dense slab: flatten all leading dims into a row axis.
    x2 = x.reshape(-1, d_model).astype(cdt)
    m = x2.shape[0]

    tile_m_default, vmem_limit, two_core = _chip_defaults()
    if tile_m is None:
        tile_m = tile_m_default
    tile_m = min(_round_up(tile_m, sub), _round_up(m, sub))
    m_pad = _round_up(m, tile_m)

    # On a 2-TC chip, guarantee >= 2 row-grid steps so both cores get work.
    if two_core:
        while m_pad // tile_m < 2 and tile_m > sub:
            tile_m = _round_up(tile_m // 2, sub)
            m_pad = _round_up(m, tile_m)

    with_mask = bool(training) and p > 0.0

    # Pick the d_ff chunk so the (double-buffered) working set fits VMEM.
    budget = int(vmem_limit * 0.85)
    if ff_chunk is None:
        n_ff = 1
        while True:
            tk = _round_up(_cdiv(d_ff, n_ff), 128)
            if (_vmem_estimate(tile_m, d_model, tk, in_bytes, out_bytes,
                               with_mask) <= budget) or tk == 128:
                break
            n_ff += 1
    else:
        tk = _round_up(ff_chunk, 128)
        n_ff = _cdiv(d_ff, tk)
    d_ff_pad = tk * n_ff

    if m_pad != m:
        x2 = jnp.pad(x2, ((0, m_pad - m), (0, 0)))

    w1c = w1.astype(cdt)
    w2c = w2.astype(cdt)
    b1c = b1.astype(jnp.float32).reshape(1, d_ff)
    b2c = b2.astype(jnp.float32).reshape(1, d_model)

    mask = None
    if with_mask:
        keep = 1.0 - p
        # Fold the inverted-dropout 1/keep scale into W2 (one tiny host-side op);
        # the kernel then multiplies by an exact {0,1} mask only.
        w2c = (w2.astype(jnp.float32) * (1.0 / keep)).astype(cdt)
        if key is None:
            key = jax.random.PRNGKey(0)
        mask = jax.random.bernoulli(key, keep, (m_pad, d_ff_pad)).astype(cdt)

    if d_ff_pad != d_ff:
        pad_ff = d_ff_pad - d_ff
        w1c = jnp.pad(w1c, ((0, 0), (0, pad_ff)))
        b1c = jnp.pad(b1c, ((0, 0), (0, pad_ff)))
        w2c = jnp.pad(w2c, ((0, pad_ff), (0, 0)))

    grid = (m_pad // tile_m, n_ff)

    in_specs = [pl.BlockSpec((tile_m, d_model), lambda i, k: (i, 0))]     # x rows
    inputs = [x2]
    if with_mask:
        in_specs.append(pl.BlockSpec((tile_m, tk), lambda i, k: (i, k)))  # mask
        inputs.append(mask)
    in_specs += [
        pl.BlockSpec((d_model, tk), lambda i, k: (0, k)),   # W1 chunk (resident if n_ff==1)
        pl.BlockSpec((1, tk), lambda i, k: (0, k)),         # b1 chunk
        pl.BlockSpec((tk, d_model), lambda i, k: (k, 0)),   # W2 chunk
        pl.BlockSpec((1, d_model), lambda i, k: (0, 0)),    # b2 (resident)
    ]
    inputs += [w1c, b1c, w2c, b2c]

    kernel = partial(_ffn_kernel, with_mask=with_mask)

    out2 = pl.pallas_call(
        kernel,
        out_shape=jax.ShapeDtypeStruct((m_pad, d_model), out_dtype),
        grid_spec=pltpu.PrefetchScalarGridSpec(
            num_scalar_prefetch=0,
            grid=grid,
            in_specs=in_specs,
            out_specs=pl.BlockSpec((tile_m, d_model), lambda i, k: (i, 0)),
            scratch_shapes=[pltpu.VMEM((tile_m, d_model), jnp.float32)],
        ),
        compiler_params=pltpu.CompilerParams(
            dimension_semantics=("parallel", "arbitrary"),
            vmem_limit_bytes=vmem_limit,
        ),
    )(*inputs)

    return out2[:m].reshape(orig_shape)


if __name__ == "__main__":
    B, T = 2, 8
    d_model, d_ff = 128, 256        # lane-dense (multiples of 128) but small
    dropout_p = 0.1

    key = jax.random.PRNGKey(0)
    kx, k1, kb1, k2, kb2, kdrop = jax.random.split(key, 6)
    x = jax.random.normal(kx, (B, T, d_model), dtype=jnp.float32)
    w1 = jax.random.normal(k1, (d_model, d_ff), dtype=jnp.float32) / math.sqrt(d_model)
    b1 = jax.random.normal(kb1, (d_ff,), dtype=jnp.float32) * 0.1
    w2 = jax.random.normal(k2, (d_ff, d_model), dtype=jnp.float32) / math.sqrt(d_ff)
    b2 = jax.random.normal(kb2, (d_model,), dtype=jnp.float32) * 0.1

    # Eval-mode forward (dropout is identity, as in PyTorch .eval()).
    out = positionwise_feed_forward(x, w1, b1, w2, b2, p=dropout_p, training=False)
    out = jax.block_until_ready(out)
    assert out.shape == (B, T, d_model)

    # Pure-JAX reference with the same bf16-operand / f32-accumulate contract.
    xb = x.reshape(-1, d_model).astype(jnp.bfloat16)
    w1b = w1.astype(jnp.bfloat16)
    w2b = w2.astype(jnp.bfloat16)
    h_ref = jnp.maximum(jnp.dot(xb, w1b, preferred_element_type=jnp.float32) + b1, 0.0)
    ref = jnp.dot(h_ref.astype(jnp.bfloat16), w2b,
                  preferred_element_type=jnp.float32) + b2
    ref = ref.astype(x.dtype).reshape(B, T, d_model)
    max_err = float(jnp.max(jnp.abs(out - ref)))
    assert jnp.allclose(out, ref, atol=2e-2, rtol=2e-2), max_err

    # Training-mode forward exercises the dropout path (mask generated with
    # jax.random in the wrapper; same distributional semantics as torch
    # dropout, not bit-identical RNG).
    out_train = positionwise_feed_forward(x, w1, b1, w2, b2, p=dropout_p,
                                          training=True, key=kdrop)
    out_train = jax.block_until_ready(out_train)
    assert out_train.shape == (B, T, d_model)
    assert bool(jnp.all(jnp.isfinite(out_train)))

    print("KERNEL_OK")
</pallas_src>

<mosaic_0001>
module attributes {stable_mosaic.version = 11 : i64} {
  func.func @_ffn_kernel(%arg0: i32, %arg1: i32, %arg2: memref<16x128xbf16, #tpu.memory_space<vmem>>, %arg3: memref<128x256xbf16, #tpu.memory_space<vmem>>, %arg4: memref<1x256xf32, #tpu.memory_space<vmem>>, %arg5: memref<256x128xbf16, #tpu.memory_space<vmem>>, %arg6: memref<1x128xf32, #tpu.memory_space<vmem>>, %arg7: memref<16x128xf32, #tpu.memory_space<vmem>>, %arg8: memref<16x128xf32, #tpu.memory_space<vmem>>) attributes {dimension_semantics = [#tpu.dimension_semantics<parallel>, #tpu.dimension_semantics<arbitrary>], iteration_bounds = array<i64: 1, 1>, scalar_prefetch = 0 : i64, scratch_operands = 1 : i64, tpu.core_type = #tpu.core_type<tc>, window_params = [{transform_indices = @transform_0, window_bounds = array<i64: 16, 128>}, {transform_indices = @transform_1, window_bounds = array<i64: 128, 256>}, {transform_indices = @transform_2, window_bounds = array<i64: 1, 256>}, {transform_indices = @transform_3, window_bounds = array<i64: 256, 128>}, {pipeline_mode = #tpu.pipeline_mode<synchronous>, transform_indices = @transform_4, window_bounds = array<i64: 1, 128>}, {transform_indices = @transform_5, window_bounds = array<i64: 16, 128>}]} {
    %c0_i32 = arith.constant 0 : i32
    %0 = arith.cmpi eq, %arg1, %c0_i32 : i32
    %1 = arith.extui %0 : i1 to i32
    %c0_i32_0 = arith.constant 0 : i32
    %2 = arith.cmpi ne, %1, %c0_i32_0 : i32
    scf.if %2 {
      %cst_16 = arith.constant 0.000000e+00 : f32
      %20 = vector.broadcast %cst_16 : f32 to vector<16x128xf32>
      %c0_17 = arith.constant 0 : index
      %c0_18 = arith.constant 0 : index
      %21 = vector.load %arg8[%c0_17, %c0_18] : memref<16x128xf32, #tpu.memory_space<vmem>>, vector<16x128xf32>
      tpu.vector_store %arg8[%c0_17, %c0_18], %20 {strides = array<i32>} : memref<16x128xf32, #tpu.memory_space<vmem>>, vector<16x128xf32>,
    } else {
    }
    %c0 = arith.constant 0 : index
    %c0_1 = arith.constant 0 : index
    %3 = vector.load %arg2[%c0, %c0_1] : memref<16x128xbf16, #tpu.memory_space<vmem>>, vector<16x128xbf16>
    %c0_2 = arith.constant 0 : index
    %c0_3 = arith.constant 0 : index
    %4 = vector.load %arg3[%c0_2, %c0_3] : memref<128x256xbf16, #tpu.memory_space<vmem>>, vector<128x256xbf16>
    %cst = arith.constant dense<0.000000e+00> : vector<16x256xf32>
    %5 = tpu.matmul %3, %4, %cst {dimension_numbers = #tpu.dot_dimension_numbers<[1], [0], [0], [1], [0, 0, 1, 1], [], []>} : vector<16x128xbf16>, vector<128x256xbf16>, vector<16x256xf32> -> vector<16x256xf32>
    %c0_4 = arith.constant 0 : index
    %c0_5 = arith.constant 0 : index
    %6 = vector.load %arg4[%c0_4, %c0_5] : memref<1x256xf32, #tpu.memory_space<vmem>>, vector<1x256xf32>
    %7 = vector.broadcast %6 : vector<1x256xf32> to vector<16x256xf32>
    %8 = arith.addf %5, %7 : vector<16x256xf32>
    %cst_6 = arith.constant 0.000000e+00 : f32
    %9 = vector.broadcast %cst_6 : f32 to vector<16x256xf32>
    %10 = arith.maximumf %8, %9 : vector<16x256xf32>
    %11 = arith.truncf %10 : vector<16x256xf32> to vector<16x256xbf16>
    %c0_7 = arith.constant 0 : index
    %c0_8 = arith.constant 0 : index
    %12 = vector.load %arg8[%c0_7, %c0_8] : memref<16x128xf32, #tpu.memory_space<vmem>>, vector<16x128xf32>
    %c0_9 = arith.constant 0 : index
    %c0_10 = arith.constant 0 : index
    %13 = vector.load %arg5[%c0_9, %c0_10] : memref<256x128xbf16, #tpu.memory_space<vmem>>, vector<256x128xbf16>
    %cst_11 = arith.constant dense<0.000000e+00> : vector<16x128xf32>
    %14 = tpu.matmul %11, %13, %cst_11 {dimension_numbers = #tpu.dot_dimension_numbers<[1], [0], [0], [1], [0, 0, 1, 1], [], []>} : vector<16x256xbf16>, vector<256x128xbf16>, vector<16x128xf32> -> vector<16x128xf32>
    %15 = arith.addf %12, %14 : vector<16x128xf32>
    %c0_12 = arith.constant 0 : index
    %c0_13 = arith.constant 0 : index
    %16 = vector.load %arg8[%c0_12, %c0_13] : memref<16x128xf32, #tpu.memory_space<vmem>>, vector<16x128xf32>
    tpu.vector_store %arg8[%c0_12, %c0_13], %15 {strides = array<i32>} : memref<16x128xf32, #tpu.memory_space<vmem>>, vector<16x128xf32>,
    %c0_i32_14 = arith.constant 0 : i32
    %17 = arith.cmpi eq, %arg1, %c0_i32_14 : i32
    %18 = arith.extui %17 : i1 to i32
    %c0_i32_15 = arith.constant 0 : i32
    %19 = arith.cmpi ne, %18, %c0_i32_15 : i32
    scf.if %19 {
      %c0_16 = arith.constant 0 : index
      %c0_17 = arith.constant 0 : index
      %20 = vector.load %arg8[%c0_16, %c0_17] : memref<16x128xf32, #tpu.memory_space<vmem>>, vector<16x128xf32>
      %c0_18 = arith.constant 0 : index
      %c0_19 = arith.constant 0 : index
      %21 = vector.load %arg6[%c0_18, %c0_19] : memref<1x128xf32, #tpu.memory_space<vmem>>, vector<1x128xf32>
      %22 = vector.broadcast %21 : vector<1x128xf32> to vector<16x128xf32>
      %23 = arith.addf %20, %22 : vector<16x128xf32>
      %c0_20 = arith.constant 0 : index
      %c0_21 = arith.constant 0 : index
      %24 = vector.load %arg7[%c0_20, %c0_21] : memref<16x128xf32, #tpu.memory_space<vmem>>, vector<16x128xf32>
      tpu.vector_store %arg7[%c0_20, %c0_21], %23 {strides = array<i32>} : memref<16x128xf32, #tpu.memory_space<vmem>>, vector<16x128xf32>,
    } else {
    }
    return
  }
  func.func @transform_0(%arg0: i32, %arg1: i32) -> (i32, i32) {
    %c0_i32 = arith.constant 0 : i32
    %c0_i32_0 = arith.constant 0 : i32
    return %arg0, %c0_i32 : i32, i32
  }
  func.func @transform_1(%arg0: i32, %arg1: i32) -> (i32, i32) {
    %c0_i32 = arith.constant 0 : i32
    %c0_i32_0 = arith.constant 0 : i32
    return %c0_i32, %arg1 : i32, i32
  }
  func.func @transform_2(%arg0: i32, %arg1: i32) -> (i32, i32) {
    %c0_i32 = arith.constant 0 : i32
    %c0_i32_0 = arith.constant 0 : i32
    return %c0_i32, %arg1 : i32, i32
  }
  func.func @transform_3(%arg0: i32, %arg1: i32) -> (i32, i32) {
    %c0_i32 = arith.constant 0 : i32
    %c0_i32_0 = arith.constant 0 : i32
    return %arg1, %c0_i32 : i32, i32
  }
  func.func @transform_4(%arg0: i32, %arg1: i32) -> (i32, i32) {
    %c0_i32 = arith.constant 0 : i32
    %c0_i32_0 = arith.constant 0 : i32
    %c0_i32_1 = arith.constant 0 : i32
    return %c0_i32, %c0_i32_0 : i32, i32
  }
  func.func @transform_5(%arg0: i32, %arg1: i32) -> (i32, i32) {
    %c0_i32 = arith.constant 0 : i32
    %c0_i32_0 = arith.constant 0 : i32
    return %arg0, %c0_i32 : i32, i32
  }
}

</mosaic_0001>

<bundles_post_ra>
// kernel: tpu_custom_call.1
= control target key start
LH: loop header
LB: loop body
LE: loop exit
PB: predicated region body
PF: predicated region fallthrough
CT: control target
= control target key end

     0   :  { %10 = vsyncpa [#allocation4], 0  ;;  %s742_s0 = inlined_call_operand.hbm [shape: bf16[16,128], index: 0, kind: input, shape index: {}]   ;;  %s743_s1 = inlined_call_operand.hbm [shape: bf16[128,256], index: 1, kind: input, shape index: {}]   ;;  %s744_s2 = inlined_call_operand.vmem [shape: f32[1,256], index: 2, kind: input, shape index: {}]   ;;  %s745_s3 = inlined_call_operand.hbm [shape: bf16[256,128], index: 3, kind: input, shape index: {}]   ;;  %s746_s4 = inlined_call_operand.vmem [shape: f32[1,128], index: 4, kind: input, shape index: {}]   ;;  %s747_s5 = inlined_call_operand.hbm [shape: f32[16,128], index: 5, kind: output, shape index: {}]  }
   0x1   :  { %11 = vsyncpa [#allocation7], 0 }
   0x2   :  { %12 = vsyncpa [#allocation5], 0  ;;  %s643_s18 = smov [#allocation6]   ;;  %s549_s22 = scalar_lea.hbm %s743_s1, 2048 }
   0x3   :  { %s30_s19 = sshll.u32 %s643_s18, 4  ;;  %p550_p0 = scmp.ne.s32.totalorder %s743_s1, %s549_s22  ;;  %s31_s19 = int_to_ptr.vmem [resolvable:$true] %s30_s19 }
   0x4   :  { %p553_p1 = scmp.lt.u32.totalorder %s549_s22, %s743_s1 }
   0x6   :  { %p555_p2 = pnand %p553_p1, %p550_p0 }
   0x8   :  { %558 = shalt.err (!%p555_p2)
}
   0x9   :  { %s559_s27 = scalar_lea.vmem %s31_s19, 2048  ;;  %p564_p4 = scmp.lt.s32.totalorder %s31_s19, %s31_s19 }
   0xa   :  { %p560_p3 = scmp.ne.s32.totalorder %s31_s19, %s559_s27  ;;  %p565_p5 = scmp.lt.s32.totalorder %s559_s27, %s559_s27 }
   0xc   :  { %p566_p6 = por %p565_p5, %p564_p4 }
   0xe   :  { %p567_p7 = pnand %p566_p6, %p560_p3 }
  0x10   :  { %570 = shalt.err (!%p567_p7)
}
  0x11   :  { %s644_s28 = smov 128   ;;  %s645_s29 = smov 8  }
  0x12   :  { %36 = dma.hbm_to_vmem [thread:$0]  %s743_s1, 2048, %s31_s19, [#allocation7], %s644_s28, %s644_s28, %s645_s29  }
  0x13   :  { %s646_s7 = smov [#allocation3]   ;;  %s571_s11 = scalar_lea.hbm %s742_s0, 128 }
  0x14   :  { %s18_s8 = sshll.u32 %s646_s7, 4  ;;  %p572_p8 = scmp.ne.s32.totalorder %s742_s0, %s571_s11  ;;  %s19_s8 = int_to_ptr.vmem [resolvable:$true] %s18_s8 }
  0x15   :  { %p575_p9 = scmp.lt.u32.totalorder %s571_s11, %s742_s0 }
  0x17   :  { %p577_p10 = pnand %p575_p9, %p572_p8 }
  0x19   :  { %580 = shalt.err (!%p577_p10)
}
  0x1a   :  { %s581_s16 = scalar_lea.vmem %s19_s8, 128  ;;  %p586_p12 = scmp.lt.s32.totalorder %s19_s8, %s19_s8 }
  0x1b   :  { %p582_p11 = scmp.ne.s32.totalorder %s19_s8, %s581_s16  ;;  %p587_p13 = scmp.lt.s32.totalorder %s581_s16, %s581_s16 }
  0x1d   :  { %p588_p0 = por %p587_p13, %p586_p12 }
  0x1f   :  { %p589_p1 = pnand %p588_p0, %p582_p11 }
  0x21   :  { %592 = shalt.err (!%p589_p1)
}
  0x22   :  { %s647_s1 = smov 64   ;;  %s648_s17 = smov 4  }
  0x23   :  { %24 = dma.hbm_to_vmem [thread:$0]  %s742_s0, 128, %s19_s8, [#allocation4], %s647_s1, %s647_s1, %s648_s17  }
  0x24   :  { %s649_s20 = smov [#allocation8]   ;;  %s593_s24 = scalar_lea.hbm %s745_s3, 2048 }
  0x25   :  { %s44_s21 = sshll.u32 %s649_s20, 4  ;;  %p594_p2 = scmp.ne.s32.totalorder %s745_s3, %s593_s24  ;;  %s45_s21 = int_to_ptr.vmem [resolvable:$true] %s44_s21 }
  0x26   :  { %p597_p3 = scmp.lt.u32.totalorder %s593_s24, %s745_s3 }
  0x28   :  { %p599_p4 = pnand %p597_p3, %p594_p2 }
  0x2a   :  { %602 = shalt.err (!%p599_p4)
}
  0x2b   :  { %s603_s6 = scalar_lea.vmem %s45_s21, 2048  ;;  %p608_p6 = scmp.lt.s32.totalorder %s45_s21, %s45_s21 }
  0x2c   :  { %p604_p5 = scmp.ne.s32.totalorder %s45_s21, %s603_s6  ;;  %p609_p7 = scmp.lt.s32.totalorder %s603_s6, %s603_s6 }
  0x2e   :  { %p610_p8 = por %p609_p7, %p608_p6 }
  0x30   :  { %p611_p9 = pnand %p610_p8, %p604_p5 }
  0x32   :  { %614 = shalt.err (!%p611_p9)
}
  0x33   :  { %50 = dma.hbm_to_vmem [thread:$0]  %s745_s3, 2048, %s45_s21, [#allocation7], %s647_s1, %s647_s1, %s648_s17  }
  0x34   :  { %637 = dma.done.wait [#allocation4], 128  }
  0x35   :  { %638 = vsyncadd [#allocation4], 4294967168 }
  0x36   :  { %639 = dma.done.wait [#allocation7], 4096  }
  0x37   :  { %640 = vsyncadd [#allocation7], 4294963200  ;;  %v650_v0 = vmov 0   ;;  %v508_v1 = vld [vmem:[#allocation6 + $0x4] ss:$8 sps:$4 sm:$0xff]   ;;  %v537_v16 = vld [vmem:[#allocation8 + $0x50] sm:$0xff]   ;;  %v89_v34 = vlaneseq }
  0x38   :  { %217 = vmatprep.mubr.bf16.mxu0 %v650_v0  ;;  %v510_v2 = vld [vmem:[#allocation6] ss:$8 sps:$4 sm:$0xff]   ;;  %185 = vmatprep.subr.bf16.mxu0 %v508_v1  ;;  %v511_v3 = vld [vmem:[#allocation6 + $0x14] ss:$8 sps:$4 sm:$0xff]   ;;  %v513_v4 = vld [vmem:[#allocation6 + $0x10] ss:$8 sps:$4 sm:$0xff]  }
  0x39   :  { %186 = vmatpush1.bf16.msra.mxu0 %v510_v2  ;;  %v514_v5 = vld [vmem:[#allocation6 + $0x24] ss:$8 sps:$4 sm:$0xff]   ;;  %v516_v6 = vld [vmem:[#allocation6 + $0x20] ss:$8 sps:$4 sm:$0xff]   ;;  %v517_v7 = vld [vmem:[#allocation6 + $0x34] ss:$8 sps:$4 sm:$0xff]  }
  0x3a   :  { %187 = vmatprep.subr.bf16.mxu0 %v511_v3  ;;  %v519_v8 = vld [vmem:[#allocation6 + $0x30] ss:$8 sps:$4 sm:$0xff]   ;;  %v520_v9 = vld [vmem:[#allocation6 + $0x44] ss:$8 sps:$4 sm:$0xff]   ;;  %v522_v11 = vld [vmem:[#allocation6 + $0x40] ss:$8 sps:$4 sm:$0xff]  }
  0x3b   :  { %v533_v10 = vld [vmem:[#allocation8 + $0x40] sm:$0xff]   ;;  %v523_v13 = vld [vmem:[#allocation6 + $0x54] ss:$8 sps:$4 sm:$0xff]   ;;  %v535_v14 = vld [vmem:[#allocation8 + $0x48] sm:$0xff]   ;;  %v90_v35 = vshrl.u32 %v89_v34, 7  ;;  %s651_s10 = smov [#allocation9]  }
  0x3c   :  { %v534_v12 = vld [vmem:[#allocation8] sm:$0xff]   ;;  %477 = vmatprep.subr.bf16.mxu1 %v533_v10  ;;  %v536_v15 = vld [vmem:[#allocation8 + $0x8] sm:$0xff]   ;;  %v525_v17 = vld [vmem:[#allocation6 + $0x50] ss:$8 sps:$4 sm:$0xff]   ;;  %s430_s11 = sshll.u32 %s651_s10, 4  ;;  %s431_s11 = int_to_ptr.vmem [resolvable:$true] %s430_s11 }
  0x3d   :  { %188 = vmatpush1.bf16.msra.mxu0 %v513_v4  ;;  %478 = vmatpush3.bf16.msra.mxu1 %v534_v12  ;;  %v526_v18 = vld [vmem:[#allocation6 + $0x64] ss:$8 sps:$4 sm:$0xff]   ;;  %v538_v19 = vld [vmem:[#allocation8 + $0x10] sm:$0xff]   ;;  %v539_v20 = vld [vmem:[#allocation8 + $0x58] sm:$0xff]   ;;  %v91_v36 = vsub.s32 0, %v90_v35  ;;  %v95_v38 = vsub.s32 1, %v90_v35  ;;  %p620_p11 = scmp.lt.s32.totalorder %s431_s11, %s431_s11 }
  0x3e   :  { %189 = vmatprep.subr.bf16.mxu0 %v514_v5  ;;  %479 = vmatprep.subr.bf16.mxu1 %v535_v14  ;;  %v528_v21 = vld [vmem:[#allocation6 + $0x60] ss:$8 sps:$4 sm:$0xff]   ;;  %v529_v22 = vld [vmem:[#allocation6 + $0x74] ss:$8 sps:$4 sm:$0xff]   ;;  %v531_v25 = vld [vmem:[#allocation6 + $0x70] ss:$8 sps:$4 sm:$0xff]  }
  0x3f   :  { %v540_v23 = vld [vmem:[#allocation8 + $0x18] sm:$0xff]   ;;  %v541_v24 = vld [vmem:[#allocation8 + $0x60] sm:$0xff]   ;;  %v543_v27 = vld [vmem:[#allocation8 + $0x68] sm:$0xff]   ;;  %s615_s12 = scalar_lea.vmem %s431_s11, 256 }
  0x40   :  { %v542_v26 = vld [vmem:[#allocation8 + $0x20] sm:$0xff]   ;;  %v532_v28 = vld [vmem:[#allocation3] sm:$0xff]   ;;  %v544_v29 = vld [vmem:[#allocation8 + $0x28] sm:$0xff]   ;;  %p616_p10 = scmp.ne.s32.totalorder %s431_s11, %s615_s12  ;;  %p621_p12 = scmp.lt.s32.totalorder %s615_s12, %s615_s12 }
  0x41   :  { %190 = vmatpush1.bf16.msra.mxu0 %v516_v6  ;;  %480 = vmatpush3.bf16.msra.mxu1 %v536_v15  ;;  %v545_v30 = vld [vmem:[#allocation8 + $0x70] sm:$0xff]   ;;  %v547_v32 = vld [vmem:[#allocation8 + $0x78] sm:$0xff]  }
  0x42   :  { %191 = vmatprep.subr.bf16.mxu0 %v517_v7  ;;  %481 = vmatprep.subr.bf16.mxu1 %v537_v16  ;;  %v546_v31 = vld [vmem:[#allocation8 + $0x30] sm:$0xff]   ;;  %v548_v33 = vld [vmem:[#allocation8 + $0x38] sm:$0xff]   ;;  %p622_p13 = por %p621_p12, %p620_p11 }
  0x43   :  { %v87_v37 = vld [vmem:[%s744_s2] sm:$0x3] }
  0x44   :  { %v92_v39 = vrot.slane %v87_v37, %v91_v36  ;;  %v96_v40 = vrot.slane %v87_v37, %v95_v38  ;;  %v476_v57 = vld [vmem:[%s746_s4] ss:$0 sm:$0xff]  ;;  %p623_p0 = pnand %p622_p13, %p616_p10 }
  0x45   :  { %192 = vmatpush1.bf16.msra.mxu0 %v519_v8  ;;  %482 = vmatpush3.bf16.msra.mxu1 %v538_v19 }
  0x46   :  { %193 = vmatprep.subr.bf16.mxu0 %v520_v9  ;;  %483 = vmatprep.subr.bf16.mxu1 %v539_v20 }
  0x49   :  { %194 = vmatpush1.bf16.msra.mxu0 %v522_v11  ;;  %484 = vmatpush3.bf16.msra.mxu1 %v540_v23 }
  0x4a   :  { %195 = vmatprep.subr.bf16.mxu0 %v523_v13  ;;  %485 = vmatprep.subr.bf16.mxu1 %v541_v24 }
  0x4d   :  { %196 = vmatpush1.bf16.msra.mxu0 %v525_v17  ;;  %486 = vmatpush3.bf16.msra.mxu1 %v542_v26 }
  0x4e   :  { %197 = vmatprep.subr.bf16.mxu0 %v526_v18  ;;  %487 = vmatprep.subr.bf16.mxu1 %v543_v27 }
  0x51   :  { %198 = vmatpush1.bf16.msra.mxu0 %v528_v21  ;;  %488 = vmatpush3.bf16.msra.mxu1 %v544_v29 }
  0x52   :  { %199 = vmatprep.subr.bf16.mxu0 %v529_v22  ;;  %489 = vmatprep.subr.bf16.mxu1 %v545_v30 }
  0x55   :  { %200 = vmatpush1.bf16.msra.mxu0 %v531_v25  ;;  %490 = vmatpush3.bf16.msra.mxu1 %v546_v31 }
  0x56   :  { %491 = vmatprep.subr.bf16.mxu1 %v547_v32 }
  0x58   :  { %218 = vmatmul.mubr.bf16.vlgmr.msra.gmra.mrb[0].mxu0 %v532_v28 }
  0x59   :  { %492 = vmatpush3.bf16.msra.mxu1 %v548_v33 }
 0x12b   :  { %v219_v41 = vpop.f32.mrb[0].mxu0 }
 0x12c   :  { %v220_v42 = vadd.f32 %v219_v41, %v92_v39  ;;  %v221_v43 = vpop.f32.mrb[1].mxu0 }
 0x12d   :  { %v222_v44 = vadd.f32 %v221_v43, %v96_v40  ;;  %v223_v45 = vpop.f32.mrb[2].mxu0 }
 0x12e   :  { %v224_v46 = vadd.f32 %v223_v45, %v92_v39  ;;  %v225_v47 = vpop.f32.mrb[3].mxu0  ;;  %v228_v49 = vmax.f32 %v220_v42, 0.0 }
 0x12f   :  { %v226_v48 = vadd.f32 %v225_v47, %v96_v40  ;;  %v229_v51 = vmax.f32 %v222_v44, 0.0 }
 0x130   :  { %v230_v50 = vmax.f32 %v224_v46, 0.0 }
 0x131   :  { %v231_v52 = vmax.f32 %v226_v48, 0.0 }
 0x132   :  { %v232_v53 = vpack.c.bf16 %v230_v50, %v228_v49 }
 0x133   :  { %v233_v54 = vpack.c.bf16 %v231_v52, %v229_v51 }
 0x135   :  { %396 = vmatprep.mubr.bf16.mxu1 %v233_v54 }
 0x136   :  { %397 = vmatmul.mubr.bf16.vlgmr.msra.gmra.mrb[0].mxu1 %v232_v53 }
 0x209   :  { %v493_v55 = vpop.f32.mrb[0].mxu1 }
 0x20a   :  { %v494_v56 = vpop.f32.mrb[1].mxu1 }
 0x20b   :  { %v495_v58 = vadd.f32 %v494_v56, %v493_v55  ;;  %v496_v59 = vpop.f32.mrb[2].mxu1 }
 0x20c   :  { %v497_v60 = vpop.f32.mrb[3].mxu1 }
 0x20d   :  { %v421_v61 = vadd.f32 %v495_v58, %v476_v57  ;;  %v498_v62 = vadd.f32 %v497_v60, %v496_v59 }
 0x20f   :  { %423 = vst [vmem:[#allocation9] sm:$0xff] %v421_v61  ;;  %v422_v63 = vadd.f32 %v498_v62, %v476_v57 }
 0x211   :  { %424 = vst [vmem:[#allocation9 + $0x8] sm:$0xff] %v422_v63 }
 0x212   :  { %626 = shalt.err (!%p623_p0)
}
 0x213   :  { %s627_s14 = scalar_lea.hbm %s747_s5, 256 }
 0x214   :  { %p628_p1 = scmp.ne.s32.totalorder %s747_s5, %s627_s14  ;;  %p631_p2 = scmp.lt.u32.totalorder %s627_s14, %s747_s5 }
 0x216   :  { %p633_p3 = pnand %p631_p2, %p628_p1 }
 0x218   :  { %636 = shalt.err (!%p633_p3)
}
 0x219   :  { %436 = dma.vmem_to_hbm [thread:$0]  %s431_s11, 256, %s747_s5, [#allocation5], %s644_s28, %s644_s28, %s645_s29  }
 0x21a   :  { %641 = dma.done.wait [#allocation5], 256  }
 0x21b   :  { %642 = vsyncadd [#allocation5], 4294967040 }
 0x21c   :  { %440 = vsyncpa [#allocation4], 1 }
 0x21d   :  { %441 = vsyncpa [#allocation7], 1 }
 0x21e   :  { %442 = vsyncpa [#allocation5], 1 }

</bundles_post_ra>
